<compile_context>
chip_gen: v7x
topology: tpu7x:2x2x1
jax: 0.10.0
libtpu: 0.0.40
codegen_flags: <defaults>
</compile_context>

<pallas_src>
import jax
import jax.numpy as jnp
from jax.experimental import pallas as pl
from jax.experimental.pallas import tpu as pltpu


_TARGET_BLOCK_ELEMS = 256 * 1024   # ~1 MiB per array at f32 (512 KiB at bf16)
_PALLAS_MIN_ELEMS = 1024           # below this, plain XLA fusion is cheaper


def _make_kernel(squash: bool):
    def kernel(cloudy_ref, pred_ref, out_ref):
        # tanh on EUP, affine + subtract on VPU; compute in f32 regardless of
        # the HBM dtype, write back in the output's native dtype.
        pred = jnp.tanh(pred_ref[...].astype(jnp.float32))
        if squash:
            pred = pred * 0.5 - 0.5
        out_ref[...] = (cloudy_ref[...].astype(jnp.float32) - pred).astype(out_ref.dtype)
    return kernel


def _pick_lane_width(total: int):
    """Widest lane-dense last dim dividing `total` (so no pad copy is needed)."""
    for lane in (2048, 1024, 512, 256, 128):
        if total % lane == 0:
            return lane, total
    # Rare ragged case (total not a multiple of 128): pad flat view to (8,128).
    lane = 128
    chunk = 8 * lane
    padded = ((total + chunk - 1) // chunk) * chunk
    return lane, padded


def cloud_addition(cloudy_input: jax.Array, cloud_pred: jax.Array,
                   *, squash: bool = True) -> jax.Array:
    assert cloudy_input.shape == cloud_pred.shape
    assert cloudy_input.dtype == cloud_pred.dtype
    orig_shape = cloudy_input.shape
    dtype = cloudy_input.dtype
    total = cloudy_input.size

    # Tiny inputs: pallas_call is pure launch/DMA overhead -> let XLA fuse it.
    if total < _PALLAS_MIN_ELEMS:
        pred = jnp.tanh(cloud_pred.astype(jnp.float32))
        if squash:
            pred = pred * 0.5 - 0.5
        return (cloudy_input.astype(jnp.float32) - pred).astype(dtype)

    lane, padded = _pick_lane_width(total)
    rows = padded // lane

    def to2d(x):
        flat = x.reshape(-1)
        if padded != total:
            # TODO(synk): only hit when total % 128 != 0; could be removed with
            # a BoundedSlice tail block, but the pad is correct and rare.
            flat = jnp.pad(flat, (0, padded - total))
        return flat.reshape(rows, lane)   # zero-copy on the no-pad path

    a2 = to2d(cloudy_input)
    p2 = to2d(cloud_pred)

    max_tile_r = max(8, _TARGET_BLOCK_ELEMS // lane)   # multiple of 8 by construction
    if rows > max_tile_r:
        tile_r = max_tile_r
    elif rows >= 16:
        # Keep at least 2 grid steps so v7x can shard across both TensorCores.
        tile_r = (((rows + 1) // 2) + 7) // 8 * 8
    else:
        tile_r = rows                                   # full-extent sublane dim
    grid_len = pl.cdiv(rows, tile_r)                    # ragged last block is masked

    itemsize = jnp.dtype(dtype).itemsize
    cost = pl.CostEstimate(flops=2 * total,
                           transcendentals=total,
                           bytes_accessed=3 * total * itemsize)

    out2 = pl.pallas_call(
        _make_kernel(squash),
        out_shape=jax.ShapeDtypeStruct((rows, lane), dtype),
        grid_spec=pltpu.PrefetchScalarGridSpec(
            num_scalar_prefetch=0,
            grid=(grid_len,),
            in_specs=[
                pl.BlockSpec((tile_r, lane), lambda i: (i, 0)),
                pl.BlockSpec((tile_r, lane), lambda i: (i, 0)),
            ],
            out_specs=pl.BlockSpec((tile_r, lane), lambda i: (i, 0)),
        ),
        compiler_params=pltpu.CompilerParams(
            dimension_semantics=("parallel",)),
        cost_estimate=cost,
    )(a2, p2)

    out = out2.reshape(-1)
    if padded != total:
        out = out[:total]
    return out.reshape(orig_shape)


def _reference(cloudy_input, cloud_pred, squash: bool = True):
    pred = jnp.tanh(cloud_pred)
    if squash:
        pred = pred * 0.5 - 0.5
    return cloudy_input - pred


if __name__ == "__main__":
    key = jax.random.PRNGKey(0)
    k1, k2, k3, k4 = jax.random.split(key, 4)

    # Smoke test at the module's natural small NCHW shape (f32).
    cloudy = jax.random.normal(k1, (2, 4, 16, 16), dtype=jnp.float32)
    pred = jax.random.normal(k2, (2, 4, 16, 16), dtype=jnp.float32)
    out = jax.block_until_ready(cloud_addition(cloudy, pred))
    ref = _reference(cloudy, pred)
    assert out.shape == cloudy.shape and out.dtype == cloudy.dtype
    assert jnp.allclose(out, ref, atol=1e-5, rtol=1e-5)

    # Native bf16 I/O + ragged row count (75 rows of 128 lanes, cdiv grid).
    cloudy_b = jax.random.normal(k3, (2, 3, 40, 40), dtype=jnp.bfloat16)
    pred_b = jax.random.normal(k4, (2, 3, 40, 40), dtype=jnp.bfloat16)
    out_b = jax.block_until_ready(cloud_addition(cloudy_b, pred_b))
    ref_b = _reference(cloudy_b.astype(jnp.float32), pred_b.astype(jnp.float32))
    assert out_b.dtype == jnp.bfloat16
    assert jnp.allclose(out_b.astype(jnp.float32), ref_b, atol=2e-2, rtol=2e-2)

    print("KERNEL_OK")
</pallas_src>

<mosaic_0001>
module attributes {stable_mosaic.version = 11 : i64} {
  func.func @kernel(%arg0: i32, %arg1: memref<1x2048xf32, #tpu.memory_space<vmem>>, %arg2: memref<1x2048xf32, #tpu.memory_space<vmem>>, %arg3: memref<1x2048xf32, #tpu.memory_space<vmem>>) attributes {dimension_semantics = [#tpu.dimension_semantics<parallel>], iteration_bounds = array<i64: 1>, scalar_prefetch = 0 : i64, scratch_operands = 0 : i64, tpu.core_type = #tpu.core_type<tc>, window_params = [{transform_indices = @transform_0, window_bounds = array<i64: 1, 2048>}, {transform_indices = @transform_1, window_bounds = array<i64: 1, 2048>}, {transform_indices = @transform_2, window_bounds = array<i64: 1, 2048>}]} {
    %c0 = arith.constant 0 : index
    %c0_0 = arith.constant 0 : index
    %0 = vector.load %arg2[%c0, %c0_0] : memref<1x2048xf32, #tpu.memory_space<vmem>>, vector<1x2048xf32>
    %1 = math.tanh %0 : vector<1x2048xf32>
    %cst = arith.constant 5.000000e-01 : f32
    %2 = vector.broadcast %cst : f32 to vector<1x2048xf32>
    %3 = arith.mulf %1, %2 : vector<1x2048xf32>
    %cst_1 = arith.constant 5.000000e-01 : f32
    %4 = vector.broadcast %cst_1 : f32 to vector<1x2048xf32>
    %5 = arith.subf %3, %4 : vector<1x2048xf32>
    %c0_2 = arith.constant 0 : index
    %c0_3 = arith.constant 0 : index
    %6 = vector.load %arg1[%c0_2, %c0_3] : memref<1x2048xf32, #tpu.memory_space<vmem>>, vector<1x2048xf32>
    %7 = arith.subf %6, %5 : vector<1x2048xf32>
    %c0_4 = arith.constant 0 : index
    %c0_5 = arith.constant 0 : index
    %8 = vector.load %arg3[%c0_4, %c0_5] : memref<1x2048xf32, #tpu.memory_space<vmem>>, vector<1x2048xf32>
    tpu.vector_store %arg3[%c0_4, %c0_5], %7 {strides = array<i32>} : memref<1x2048xf32, #tpu.memory_space<vmem>>, vector<1x2048xf32>,
    return
  }
  func.func @transform_0(%arg0: i32) -> (i32, i32) {
    %c0_i32 = arith.constant 0 : i32
    %c0_i32_0 = arith.constant 0 : i32
    return %arg0, %c0_i32 : i32, i32
  }
  func.func @transform_1(%arg0: i32) -> (i32, i32) {
    %c0_i32 = arith.constant 0 : i32
    %c0_i32_0 = arith.constant 0 : i32
    return %arg0, %c0_i32 : i32, i32
  }
  func.func @transform_2(%arg0: i32) -> (i32, i32) {
    %c0_i32 = arith.constant 0 : i32
    %c0_i32_0 = arith.constant 0 : i32
    return %arg0, %c0_i32 : i32, i32
  }
}

</mosaic_0001>

<bundles_post_ra>
// kernel: tpu_custom_call.1
= control target key start
LH: loop header
LB: loop body
LE: loop exit
PB: predicated region body
PF: predicated region fallthrough
CT: control target
= control target key end

     0   :  { %7 = vsyncpa [#allocation3], 0  ;;  %s201_s0 = inlined_call_operand.hbm [shape: f32[1,2048], index: 0, kind: input, shape index: {}]   ;;  %s202_s1 = inlined_call_operand.hbm [shape: f32[1,2048], index: 1, kind: input, shape index: {}]   ;;  %s203_s2 = inlined_call_operand.hbm [shape: f32[1,2048], index: 2, kind: output, shape index: {}]  }
   0x1   :  { %8 = vsyncpa [#allocation6], 0 }
   0x2   :  { %9 = vsyncpa [#allocation4], 0  ;;  %s147_s9 = smov [#allocation2]   ;;  %s148_s11 = smov [#allocation5]  }
   0x3   :  { %s16_s10 = sshll.u32 %s147_s9, 4  ;;  %s26_s12 = sshll.u32 %s148_s11, 4  ;;  %s17_s10 = int_to_ptr.vmem [resolvable:$true] %s16_s10  ;;  %s27_s12 = int_to_ptr.vmem [resolvable:$true] %s26_s12 }
   0x4   :  { %s75_s15 = scalar_lea.hbm %s201_s0, 256 }
   0x5   :  { %p76_p0 = scmp.ne.s32.totalorder %s201_s0, %s75_s15  ;;  %p79_p1 = scmp.lt.u32.totalorder %s75_s15, %s201_s0 }
   0x7   :  { %p81_p2 = pnand %p79_p1, %p76_p0 }
   0x9   :  { %84 = shalt.err (!%p81_p2)
}
   0xa   :  { %s85_s20 = scalar_lea.vmem %s17_s10, 256  ;;  %p90_p4 = scmp.lt.s32.totalorder %s17_s10, %s17_s10 }
   0xb   :  { %p86_p3 = scmp.ne.s32.totalorder %s17_s10, %s85_s20  ;;  %p91_p5 = scmp.lt.s32.totalorder %s85_s20, %s85_s20 }
   0xd   :  { %p92_p6 = por %p91_p5, %p90_p4 }
   0xf   :  { %p93_p7 = pnand %p92_p6, %p86_p3 }
  0x11   :  { %96 = shalt.err (!%p93_p7)
}
  0x12   :  { %19 = dma.hbm_to_vmem [thread:$0]  %s201_s0, 256, %s17_s10, [#allocation3]  }
  0x13   :  { %s97_s25 = scalar_lea.hbm %s202_s1, 256 }
  0x14   :  { %p98_p8 = scmp.ne.s32.totalorder %s202_s1, %s97_s25  ;;  %p101_p9 = scmp.lt.u32.totalorder %s97_s25, %s202_s1 }
  0x16   :  { %p103_p10 = pnand %p101_p9, %p98_p8 }
  0x18   :  { %106 = shalt.err (!%p103_p10)
}
  0x19   :  { %s107_s30 = scalar_lea.vmem %s27_s12, 256  ;;  %p112_p12 = scmp.lt.s32.totalorder %s27_s12, %s27_s12 }
  0x1a   :  { %p108_p11 = scmp.ne.s32.totalorder %s27_s12, %s107_s30  ;;  %p113_p13 = scmp.lt.s32.totalorder %s107_s30, %s107_s30 }
  0x1c   :  { %p114_p0 = por %p113_p13, %p112_p12 }
  0x1e   :  { %p115_p1 = pnand %p114_p0, %p108_p11 }
  0x20   :  { %118 = shalt.err (!%p115_p1)
}
  0x21   :  { %29 = dma.hbm_to_vmem [thread:$0]  %s202_s1, 256, %s27_s12, [#allocation6]  }
  0x22   :  { %141 = dma.done.wait [#allocation3], 256  }
  0x23   :  { %142 = vsyncadd [#allocation3], 4294967040 }
  0x24   :  { %143 = dma.done.wait [#allocation6], 256  }
  0x25   :  { %144 = vsyncadd [#allocation6], 4294967040  ;;  %v36_v0 = vld [vmem:[#allocation5] sm:$0xff]  ;;  %v37_v1 = vld [vmem:[#allocation5 + $0x8] sm:$0xff]  ;;  %s149_s4 = smov [#allocation7]  }
  0x26   :  { %71 = vtanh.f32 %v36_v0  ;;  %v44_v5 = vld [vmem:[#allocation2] sm:$0xff]  ;;  %v45_v8 = vld [vmem:[#allocation2 + $0x8] sm:$0xff]  ;;  %s56_s5 = sshll.u32 %s149_s4, 4  ;;  %s57_s5 = int_to_ptr.vmem [resolvable:$true] %s56_s5 }
  0x27   :  { %73 = vtanh.f32 %v37_v1  ;;  %s119_s1 = scalar_lea.vmem %s57_s5, 256  ;;  %p124_p3 = scmp.lt.s32.totalorder %s57_s5, %s57_s5 }
  0x28   :  { %p120_p2 = scmp.ne.s32.totalorder %s57_s5, %s119_s1  ;;  %p125_p4 = scmp.lt.s32.totalorder %s119_s1, %s119_s1 }
  0x2a   :  { %p126_p5 = por %p125_p4, %p124_p3 }
  0x2c   :  { %p127_p6 = pnand %p126_p5, %p120_p2 }
  0x30   :  { %v72_v2 = vpop.eup %71 }
  0x31   :  { %v74_v3 = vpop.eup %73  ;;  %v40_v4 = vmul.f32 0.5, %v72_v2 }
  0x32   :  { %v41_v6 = vmul.f32 0.5, %v74_v3 }
  0x33   :  { %v66_v7 = vadd.f32 -0.5, %v40_v4 }
  0x34   :  { %v67_v9 = vadd.f32 -0.5, %v41_v6 }
  0x35   :  { %v46_v10 = vsub.f32 %v44_v5, %v66_v7 }
  0x36   :  { %v47_v11 = vsub.f32 %v45_v8, %v67_v9 }
  0x37   :  { %48 = vst [vmem:[#allocation7] sm:$0xff] %v46_v10 }
  0x38   :  { %49 = vst [vmem:[#allocation7 + $0x8] sm:$0xff] %v47_v11 }
  0x39   :  { %130 = shalt.err (!%p127_p6)
}
  0x3a   :  { %s131_s8 = scalar_lea.hbm %s203_s2, 256 }
  0x3b   :  { %p132_p7 = scmp.ne.s32.totalorder %s203_s2, %s131_s8  ;;  %p135_p8 = scmp.lt.u32.totalorder %s131_s8, %s203_s2 }
  0x3d   :  { %p137_p9 = pnand %p135_p8, %p132_p7 }
  0x3f   :  { %140 = shalt.err (!%p137_p9)
}
  0x40   :  { %59 = dma.vmem_to_hbm [thread:$0]  %s57_s5, 256, %s203_s2, [#allocation4]  }
  0x41   :  { %145 = dma.done.wait [#allocation4], 256  }
  0x42   :  { %146 = vsyncadd [#allocation4], 4294967040 }
  0x43   :  { %63 = vsyncpa [#allocation3], 1 }
  0x44   :  { %64 = vsyncpa [#allocation6], 1 }
  0x45   :  { %65 = vsyncpa [#allocation4], 1 }

</bundles_post_ra>
